<compile_context>
chip_gen: v7x
topology: tpu7x:2x2x1
jax: 0.10.0
libtpu: 0.0.40
codegen_flags: <defaults>
</compile_context>

<pallas_src>
import functools

import jax
import jax.numpy as jnp
from jax.experimental import pallas as pl
from jax.experimental.pallas import tpu as pltpu

LANE = 128


def _batch_bound_kernel(x_ref, o_ref, *, exponent):
    # x_ref: (B, tile_rows, 128) block; the full batch is resident so the
    # dim-0 reduction happens entirely inside the kernel.
    x = x_ref[...]
    if exponent == 1.0:          # polarization == 0: pow is the identity
        tx = x
    else:
        tx = jnp.power(x, exponent)
    # Reduce over the leading (batch) axis: cross-vreg VPU max, keeps lanes dense.
    maxi = jnp.max(jnp.abs(tx), axis=0, keepdims=True)        # (1, tile_rows, 128)
    inv = pl.reciprocal(maxi, approx=True)                    # EUP, tile-sized only
    o_ref[...] = tx * inv


def _choose_tile_rows(rows, batch, itemsize,
                      target_block_bytes=2 << 20, whole_cap_bytes=6 << 20):
    """Pick the row-tile (second-minor block dim). Returns (tile_rows, row_pad)."""
    row_bytes = batch * LANE * itemsize
    target = max(8, target_block_bytes // max(row_bytes, 1))
    if rows <= target:
        return rows, 0                          # one block covers every row
    # Largest sublane-aligned divisor of `rows` that fits the target block size.
    start = min(target, rows)
    start -= start % 8
    for d in range(start, 7, -8):
        if rows % d == 0:
            return d, 0
    # No clean divisor: take the whole array if it is small, else pad the rows.
    if rows * row_bytes <= whole_cap_bytes:
        return rows, 0
    tile = max(8, (target // 8) * 8)
    return tile, (-rows) % tile


def batch_bound(x, polarization=0):
    """x: (B, C, H, W) float32. Returns tx / amax(|tx|, axis=0)."""
    exponent = 1.0 / (2 * polarization + 1)
    B, C, H, W = x.shape
    N = C * H * W
    dtype = x.dtype
    itemsize = jnp.dtype(dtype).itemsize

    xf = x.reshape(B, N)
    lane_pad = (-N) % LANE                      # rare: N is usually 128-aligned
    if lane_pad:
        xf = jnp.pad(xf, ((0, 0), (0, lane_pad)))
    R = (N + lane_pad) // LANE

    tile_rows, row_pad = _choose_tile_rows(R, B, itemsize)
    x3 = xf.reshape(B, R, LANE)
    if row_pad:
        x3 = jnp.pad(x3, ((0, 0), (0, row_pad), (0, 0)))
    Rp = R + row_pad

    kernel = functools.partial(_batch_bound_kernel, exponent=exponent)

    out3 = pl.pallas_call(
        kernel,
        out_shape=jax.ShapeDtypeStruct((B, Rp, LANE), dtype),
        grid_spec=pltpu.PrefetchScalarGridSpec(
            num_scalar_prefetch=0,
            grid=(Rp // tile_rows,),
            in_specs=[pl.BlockSpec((B, tile_rows, LANE), lambda j: (0, j, 0))],
            out_specs=pl.BlockSpec((B, tile_rows, LANE), lambda j: (0, j, 0)),
        ),
        compiler_params=pltpu.CompilerParams(
            dimension_semantics=("parallel",),   # lets v7x shard rows over 2 TCs
            vmem_limit_bytes=32 << 20,           # safe on v5e/v6e/v7x; >> block needs
        ),
    )(x3)

    if lane_pad or row_pad:
        out = out3.reshape(B, Rp * LANE)[:, :N]
    else:
        out = out3
    return out.reshape(B, C, H, W)


def batch_bound_ref(x, polarization=0):
    exponent = 1.0 / (2 * polarization + 1)
    tx = jnp.power(x, exponent)
    maxi = jnp.max(jnp.abs(tx), axis=0)
    return tx / maxi


if __name__ == "__main__":
    key = jax.random.PRNGKey(0)

    # Case 1: default polarization=0 (pow is identity), B=2, C=4, 16x16.
    x = jax.random.normal(key, (2, 4, 16, 16), dtype=jnp.float32)
    out = jax.block_until_ready(batch_bound(x, polarization=0))
    ref = batch_bound_ref(x, polarization=0)
    assert out.shape == x.shape
    # Tolerance covers the EUP approximate-reciprocal numerics (output <= 1).
    assert jnp.allclose(out, ref, atol=5e-3, rtol=5e-3), "mismatch vs reference (p=0)"

    # Case 2: polarization=1 (cube root) on positive inputs to exercise the pow path.
    x2 = jnp.abs(jax.random.normal(jax.random.PRNGKey(1), (2, 4, 16, 16),
                                   dtype=jnp.float32)) + 0.1
    out2 = jax.block_until_ready(batch_bound(x2, polarization=1))
    ref2 = batch_bound_ref(x2, polarization=1)
    assert jnp.allclose(out2, ref2, atol=5e-3, rtol=5e-3), "mismatch vs reference (p=1)"

    print("KERNEL_OK")
</pallas_src>

<mosaic_0001>
module attributes {stable_mosaic.version = 11 : i64} {
  func.func @_batch_bound_kernel(%arg0: i32, %arg1: memref<2x8x128xf32, #tpu.memory_space<vmem>>, %arg2: memref<2x8x128xf32, #tpu.memory_space<vmem>>) attributes {dimension_semantics = [#tpu.dimension_semantics<parallel>], iteration_bounds = array<i64: 1>, scalar_prefetch = 0 : i64, scratch_operands = 0 : i64, tpu.core_type = #tpu.core_type<tc>, window_params = [{transform_indices = @transform_0, window_bounds = array<i64: 2, 8, 128>}, {transform_indices = @transform_1, window_bounds = array<i64: 2, 8, 128>}]} {
    %c0 = arith.constant 0 : index
    %c0_0 = arith.constant 0 : index
    %c0_1 = arith.constant 0 : index
    %0 = vector.load %arg1[%c0, %c0_0, %c0_1] : memref<2x8x128xf32, #tpu.memory_space<vmem>>, vector<2x8x128xf32>
    %1 = math.absf %0 : vector<2x8x128xf32>
    %cst = arith.constant dense<0xFF800000> : vector<8x128xf32>
    %2 = vector.multi_reduction <maximumf>, %1, %cst [0] : vector<2x8x128xf32> to vector<8x128xf32>
    %3 = vector.shape_cast %2 : vector<8x128xf32> to vector<1x8x128xf32>
    %4 = tpu.reciprocal %3 {approx = true} : vector<1x8x128xf32> -> vector<1x8x128xf32>
    %5 = vector.broadcast %4 : vector<1x8x128xf32> to vector<2x8x128xf32>
    %6 = arith.mulf %0, %5 : vector<2x8x128xf32>
    %c0_2 = arith.constant 0 : index
    %c0_3 = arith.constant 0 : index
    %c0_4 = arith.constant 0 : index
    %7 = vector.load %arg2[%c0_2, %c0_3, %c0_4] : memref<2x8x128xf32, #tpu.memory_space<vmem>>, vector<2x8x128xf32>
    tpu.vector_store %arg2[%c0_2, %c0_3, %c0_4], %6 {strides = array<i32>} : memref<2x8x128xf32, #tpu.memory_space<vmem>>, vector<2x8x128xf32>,
    return
  }
  func.func @transform_0(%arg0: i32) -> (i32, i32, i32) {
    %c0_i32 = arith.constant 0 : i32
    %c0_i32_0 = arith.constant 0 : i32
    %c0_i32_1 = arith.constant 0 : i32
    return %c0_i32, %arg0, %c0_i32_0 : i32, i32, i32
  }
  func.func @transform_1(%arg0: i32) -> (i32, i32, i32) {
    %c0_i32 = arith.constant 0 : i32
    %c0_i32_0 = arith.constant 0 : i32
    %c0_i32_1 = arith.constant 0 : i32
    return %c0_i32, %arg0, %c0_i32_0 : i32, i32, i32
  }
}

</mosaic_0001>

<bundles_post_ra>
// kernel: tpu_custom_call.1
= control target key start
LH: loop header
LB: loop body
LE: loop exit
PB: predicated region body
PF: predicated region fallthrough
CT: control target
= control target key end

     0   :  { %6 = vsyncpa [#allocation3], 0  ;;  %s148_s0 = inlined_call_operand.hbm [shape: f32[2,8,128], index: 0, kind: input, shape index: {}]   ;;  %s149_s1 = inlined_call_operand.hbm [shape: f32[2,8,128], index: 1, kind: output, shape index: {}]  }
   0x1   :  { %7 = vsyncpa [#allocation4], 0  ;;  %s104_s6 = smov [#allocation2]   ;;  %s56_s10 = scalar_lea.hbm %s148_s0, 256 }
   0x2   :  { %s13_s7 = sshll.u32 %s104_s6, 4  ;;  %p57_p0 = scmp.ne.s32.totalorder %s148_s0, %s56_s10  ;;  %s14_s7 = int_to_ptr.vmem [resolvable:$true] %s13_s7 }
   0x3   :  { %p60_p1 = scmp.lt.u32.totalorder %s56_s10, %s148_s0 }
   0x5   :  { %p62_p2 = pnand %p60_p1, %p57_p0 }
   0x7   :  { %65 = shalt.err (!%p62_p2)
}
   0x8   :  { %s66_s15 = scalar_lea.vmem %s14_s7, 256  ;;  %p71_p4 = scmp.lt.s32.totalorder %s14_s7, %s14_s7 }
   0x9   :  { %p67_p3 = scmp.ne.s32.totalorder %s14_s7, %s66_s15  ;;  %p72_p5 = scmp.lt.s32.totalorder %s66_s15, %s66_s15 }
   0xb   :  { %p73_p6 = por %p72_p5, %p71_p4 }
   0xd   :  { %p74_p7 = pnand %p73_p6, %p67_p3 }
   0xf   :  { %77 = shalt.err (!%p74_p7)
}
  0x10   :  { %s105_s16 = smov 128   ;;  %s106_s17 = smov 8  }
  0x11   :  { %19 = dma.hbm_to_vmem [thread:$0]  %s148_s0, 256, %s14_s7, [#allocation3], %s105_s16, %s105_s16, %s106_s17  }
  0x12   :  { %100 = dma.done.wait [#allocation3], 256  }
  0x13   :  { %101 = vsyncadd [#allocation3], 4294967040  ;;  %v23_v0 = vld [vmem:[#allocation2] sm:$0xff]  ;;  %v24_v1 = vld [vmem:[#allocation2 + $0x8] sm:$0xff]  ;;  %s107_s20 = smov [#allocation5]  }
  0x14   :  { %v25_v2 = vand.u32 2147483647, %v23_v0  ;;  %v26_v3 = vand.u32 2147483647, %v24_v1  ;;  %s38_s21 = sshll.u32 %s107_s20, 4  ;;  %s39_s21 = int_to_ptr.vmem [resolvable:$true] %s38_s21 }
  0x15   :  { %s78_s22 = scalar_lea.vmem %s39_s21, 256  ;;  %p83_p9 = scmp.lt.s32.totalorder %s39_s21, %s39_s21 }
  0x16   :  { %v27_v4 = vmax.f32.f32 %v25_v2, %v26_v3  ;;  %p79_p8 = scmp.ne.s32.totalorder %s39_s21, %s78_s22  ;;  %p84_p10 = scmp.lt.s32.totalorder %s78_s22, %s78_s22 }
  0x18   :  { %54 = vrcp.f32 %v27_v4  ;;  %p85_p11 = por %p84_p10, %p83_p9 }
  0x1a   :  { %p86_p12 = pnand %p85_p11, %p79_p8 }
  0x22   :  { %v55_v5 = vpop.eup %54 }
  0x23   :  { %v29_v6 = vmul.f32 %v55_v5, %v23_v0  ;;  %v30_v7 = vmul.f32 %v55_v5, %v24_v1 }
  0x25   :  { %31 = vst [vmem:[#allocation5] sm:$0xff] %v29_v6  ;;  %32 = vst [vmem:[#allocation5 + $0x8] sm:$0xff] %v30_v7 }
  0x26   :  { %89 = shalt.err (!%p86_p12)
}
  0x27   :  { %s90_s24 = scalar_lea.hbm %s149_s1, 256 }
  0x28   :  { %p91_p13 = scmp.ne.s32.totalorder %s149_s1, %s90_s24  ;;  %p94_p0 = scmp.lt.u32.totalorder %s90_s24, %s149_s1 }
  0x2a   :  { %p96_p1 = pnand %p94_p0, %p91_p13 }
  0x2c   :  { %99 = shalt.err (!%p96_p1)
}
  0x2d   :  { %44 = dma.vmem_to_hbm [thread:$0]  %s39_s21, 256, %s149_s1, [#allocation4], %s105_s16, %s105_s16, %s106_s17  }
  0x2e   :  { %102 = dma.done.wait [#allocation4], 256  }
  0x2f   :  { %103 = vsyncadd [#allocation4], 4294967040 }
  0x30   :  { %48 = vsyncpa [#allocation3], 1 }
  0x31   :  { %49 = vsyncpa [#allocation4], 1 }

</bundles_post_ra>
